<compile_context>
chip_gen: v6e
topology: v6e:2x2x1
jax: 0.10.0
libtpu: 0.0.40
codegen_flags: <defaults>
</compile_context>

<pallas_src>
import functools

import jax
import jax.numpy as jnp
from jax.experimental import pallas as pl
from jax.experimental.pallas import tpu as pltpu


def _round_up(x, m):
    return ((x + m - 1) // m) * m


def fusion_kernel(hs_ref, hm_ref, wqs_ref, wkv_ref, wo_a_ref, b_ref, out_ref,
                  *, hid_pad, out_pad):
    hs = hs_ref[...]                                   # [tile_n, S]
    hm = hm_ref[...]                                   # [tile_n, M]

    # One wide MXU push for the h_struct LHS: [tile_n, S] @ [S, out_pad+hid_pad]
    qs = jnp.dot(hs, wqs_ref[...], preferred_element_type=jnp.float32)
    out_s = qs[:, :out_pad]                            # hs @ Wo_struct  [tile_n, out_pad]
    q = qs[:, out_pad:]                                # hs @ Wq         [tile_n, hid_pad]

    # One wide MXU push for the h_sem LHS: [tile_n, M] @ [M, 2*hid_pad]
    kv = jnp.dot(hm, wkv_ref[...], preferred_element_type=jnp.float32)
    k = kv[:, :hid_pad]                                # [tile_n, hid_pad]
    v = kv[:, hid_pad:]                                # [tile_n, hid_pad]

    # Padded lanes of q/k/v are zero, so they do not change the reduction.
    scores = jnp.sum(q * k, axis=-1, keepdims=True)    # [tile_n, 1]  (XLU)
    attn = jax.nn.sigmoid(scores) * v                  # [tile_n, hid_pad] (EUP + VPU)

    # out = cat([hs, attn]) @ Wo^T + b == out_s + attn @ Wo_attn + b
    out = (out_s
           + jnp.dot(attn, wo_a_ref[...], preferred_element_type=jnp.float32)
           + b_ref[...])
    out_ref[...] = out.astype(out_ref.dtype)           # lane-dense (128) store


def cross_modal_fusion(h_struct, h_sem, wq_t, wk_t, wv_t, wo_t, bo, *, tile_n=1024):
    """wq_t: [S, H]; wk_t/wv_t: [M, H]; wo_t: [S+H, S]; bo: [S]. Returns [N, S]."""
    n, struct_dim = h_struct.shape
    sem_dim = h_sem.shape[1]
    hid_dim = wq_t.shape[1]

    hid_pad = _round_up(hid_dim, 128)     # lane-pad hidden dim
    out_pad = _round_up(struct_dim, 128)  # lane-pad output dim

    # Split the concat-Linear weight:  Wo^T = [Wo_struct ; Wo_attn]
    wo_s = wo_t[:struct_dim, :]           # [S, S]
    wo_a = wo_t[struct_dim:, :]           # [H, S]

    # Zero-pad lane dims to 128 and fuse shared-LHS weights.
    wo_s_p = jnp.pad(wo_s, ((0, 0), (0, out_pad - struct_dim)))     # [S, out_pad]
    wq_p = jnp.pad(wq_t, ((0, 0), (0, hid_pad - hid_dim)))          # [S, hid_pad]
    w_qs = jnp.concatenate([wo_s_p, wq_p], axis=1)                  # [S, out_pad+hid_pad]

    wk_p = jnp.pad(wk_t, ((0, 0), (0, hid_pad - hid_dim)))          # [M, hid_pad]
    wv_p = jnp.pad(wv_t, ((0, 0), (0, hid_pad - hid_dim)))          # [M, hid_pad]
    w_kv = jnp.concatenate([wk_p, wv_p], axis=1)                    # [M, 2*hid_pad]

    wo_a_p = jnp.pad(wo_a, ((0, hid_pad - hid_dim), (0, out_pad - struct_dim)))  # [hid_pad, out_pad]
    b_p = jnp.pad(bo, (0, out_pad - struct_dim)).reshape(1, out_pad)             # [1, out_pad]

    # Row tile: whole batch in one step for small N; multiple of 8 always.
    tile_n = min(tile_n, _round_up(n, 8))
    grid = (pl.cdiv(n, tile_n),)

    kernel = functools.partial(fusion_kernel, hid_pad=hid_pad, out_pad=out_pad)

    out_p = pl.pallas_call(
        kernel,
        out_shape=jax.ShapeDtypeStruct((n, out_pad), h_struct.dtype),
        grid=grid,
        in_specs=[
            pl.BlockSpec((tile_n, struct_dim), lambda i: (i, 0)),            # h_struct tile
            pl.BlockSpec((tile_n, sem_dim), lambda i: (i, 0)),               # h_sem tile
            pl.BlockSpec((struct_dim, out_pad + hid_pad), lambda i: (0, 0)),  # [Wo_s | Wq]
            pl.BlockSpec((sem_dim, 2 * hid_pad), lambda i: (0, 0)),           # [Wk | Wv]
            pl.BlockSpec((hid_pad, out_pad), lambda i: (0, 0)),               # Wo_attn
            pl.BlockSpec((1, out_pad), lambda i: (0, 0)),                     # bias
        ],
        out_specs=pl.BlockSpec((tile_n, out_pad), lambda i: (i, 0)),
        compiler_params=pltpu.CompilerParams(
            dimension_semantics=("parallel",),          # megacore-shardable on v7x
            vmem_limit_bytes=32 * 1024 * 1024,          # explicit; safe on v5e/v6e/v7x
        ),
    )(h_struct, h_sem, w_qs, w_kv, wo_a_p, b_p)

    return out_p[:, :struct_dim]   # drop lane padding before returning


def reference(h_struct, h_sem, wq_t, wk_t, wv_t, wo_t, bo):
    q = h_struct @ wq_t
    k = h_sem @ wk_t
    v = h_sem @ wv_t
    scores = jnp.sum(q * k, axis=-1, keepdims=True)
    attn = jax.nn.sigmoid(scores) * v
    fused = jnp.concatenate([h_struct, attn], axis=1)
    return fused @ wo_t + bo[None, :]


if __name__ == "__main__":
    # Small deterministic shapes consistent with the module.
    N, STRUCT, SEM, HID = 16, 32, 48, 64
    key = jax.random.PRNGKey(0)
    k_hs, k_hm, k_wq, k_wk, k_wv, k_wo, k_b = jax.random.split(key, 7)

    h_struct = jax.random.normal(k_hs, (N, STRUCT), dtype=jnp.float32)
    h_sem = jax.random.normal(k_hm, (N, SEM), dtype=jnp.float32)

    # Parameters (deterministic init; stored already transposed as [in, out]).
    wq_t = jax.random.normal(k_wq, (STRUCT, HID), dtype=jnp.float32) * 0.05
    wk_t = jax.random.normal(k_wk, (SEM, HID), dtype=jnp.float32) * 0.05
    wv_t = jax.random.normal(k_wv, (SEM, HID), dtype=jnp.float32) * 0.05
    wo_t = jax.random.normal(k_wo, (STRUCT + HID, STRUCT), dtype=jnp.float32) * 0.05
    bo = jax.random.normal(k_b, (STRUCT,), dtype=jnp.float32) * 0.05

    out = cross_modal_fusion(h_struct, h_sem, wq_t, wk_t, wv_t, wo_t, bo)
    out = jax.block_until_ready(out)
    ref = reference(h_struct, h_sem, wq_t, wk_t, wv_t, wo_t, bo)
    assert out.shape == (N, STRUCT)
    assert jnp.allclose(out, ref, atol=1e-4, rtol=1e-4), "mismatch vs JAX reference"

    # Second check: ragged batch (rows not a multiple of 8) + multi-step grid,
    # exercising the padded/masked last block and multi-tile path.
    N2 = 100
    h_struct2 = jax.random.normal(k_hs, (N2, STRUCT), dtype=jnp.float32)
    h_sem2 = jax.random.normal(k_hm, (N2, SEM), dtype=jnp.float32)
    out2 = cross_modal_fusion(h_struct2, h_sem2, wq_t, wk_t, wv_t, wo_t, bo, tile_n=64)
    out2 = jax.block_until_ready(out2)
    ref2 = reference(h_struct2, h_sem2, wq_t, wk_t, wv_t, wo_t, bo)
    assert out2.shape == (N2, STRUCT)
    assert jnp.allclose(out2, ref2, atol=1e-4, rtol=1e-4), "mismatch vs JAX reference (ragged)"

    print("KERNEL_OK")
</pallas_src>

<mosaic_0001>
module attributes {stable_mosaic.version = 11 : i64} {
  func.func @fusion_kernel(%arg0: i32, %arg1: memref<16x32xf32, #tpu.memory_space<vmem>>, %arg2: memref<16x48xf32, #tpu.memory_space<vmem>>, %arg3: memref<32x256xf32, #tpu.memory_space<vmem>>, %arg4: memref<48x256xf32, #tpu.memory_space<vmem>>, %arg5: memref<128x128xf32, #tpu.memory_space<vmem>>, %arg6: memref<1x128xf32, #tpu.memory_space<vmem>>, %arg7: memref<16x128xf32, #tpu.memory_space<vmem>>) attributes {dimension_semantics = [#tpu.dimension_semantics<parallel>], iteration_bounds = array<i64: 1>, scalar_prefetch = 0 : i64, scratch_operands = 0 : i64, tpu.core_type = #tpu.core_type<tc>, window_params = [{transform_indices = @transform_0, window_bounds = array<i64: 16, 32>}, {transform_indices = @transform_1, window_bounds = array<i64: 16, 48>}, {pipeline_mode = #tpu.pipeline_mode<synchronous>, transform_indices = @transform_2, window_bounds = array<i64: 32, 256>}, {pipeline_mode = #tpu.pipeline_mode<synchronous>, transform_indices = @transform_3, window_bounds = array<i64: 48, 256>}, {pipeline_mode = #tpu.pipeline_mode<synchronous>, transform_indices = @transform_4, window_bounds = array<i64: 128, 128>}, {pipeline_mode = #tpu.pipeline_mode<synchronous>, transform_indices = @transform_5, window_bounds = array<i64: 1, 128>}, {transform_indices = @transform_6, window_bounds = array<i64: 16, 128>}]} {
    %c0 = arith.constant 0 : index
    %c0_0 = arith.constant 0 : index
    %0 = vector.load %arg1[%c0, %c0_0] : memref<16x32xf32, #tpu.memory_space<vmem>>, vector<16x32xf32>
    %c0_1 = arith.constant 0 : index
    %c0_2 = arith.constant 0 : index
    %1 = vector.load %arg2[%c0_1, %c0_2] : memref<16x48xf32, #tpu.memory_space<vmem>>, vector<16x48xf32>
    %c0_3 = arith.constant 0 : index
    %c0_4 = arith.constant 0 : index
    %2 = vector.load %arg3[%c0_3, %c0_4] : memref<32x256xf32, #tpu.memory_space<vmem>>, vector<32x256xf32>
    %cst = arith.constant dense<0.000000e+00> : vector<16x256xf32>
    %3 = tpu.matmul %0, %2, %cst {dimension_numbers = #tpu.dot_dimension_numbers<[1], [0], [0], [1], [0, 0, 1, 1], [], []>} : vector<16x32xf32>, vector<32x256xf32>, vector<16x256xf32> -> vector<16x256xf32>
    %4 = vector.extract_strided_slice %3 {offsets = [0, 0], sizes = [16, 128], strides = [1, 1]} : vector<16x256xf32> to vector<16x128xf32>
    %5 = vector.extract_strided_slice %3 {offsets = [0, 128], sizes = [16, 128], strides = [1, 1]} : vector<16x256xf32> to vector<16x128xf32>
    %c0_5 = arith.constant 0 : index
    %c0_6 = arith.constant 0 : index
    %6 = vector.load %arg4[%c0_5, %c0_6] : memref<48x256xf32, #tpu.memory_space<vmem>>, vector<48x256xf32>
    %cst_7 = arith.constant dense<0.000000e+00> : vector<16x256xf32>
    %7 = tpu.matmul %1, %6, %cst_7 {dimension_numbers = #tpu.dot_dimension_numbers<[1], [0], [0], [1], [0, 0, 1, 1], [], []>} : vector<16x48xf32>, vector<48x256xf32>, vector<16x256xf32> -> vector<16x256xf32>
    %8 = vector.extract_strided_slice %7 {offsets = [0, 0], sizes = [16, 128], strides = [1, 1]} : vector<16x256xf32> to vector<16x128xf32>
    %9 = vector.extract_strided_slice %7 {offsets = [0, 128], sizes = [16, 128], strides = [1, 1]} : vector<16x256xf32> to vector<16x128xf32>
    %10 = arith.mulf %5, %8 : vector<16x128xf32>
    %cst_8 = arith.constant dense<0.000000e+00> : vector<16xf32>
    %11 = vector.multi_reduction <add>, %10, %cst_8 [1] : vector<16x128xf32> to vector<16xf32>
    %12 = vector.shape_cast %11 : vector<16xf32> to vector<16x1xf32>
    %13 = arith.negf %12 : vector<16x1xf32>
    %14 = math.exp %13 : vector<16x1xf32>
    %cst_9 = arith.constant 1.000000e+00 : f32
    %15 = vector.broadcast %cst_9 : f32 to vector<16x1xf32>
    %16 = arith.addf %15, %14 : vector<16x1xf32>
    %17 = arith.divf %15, %16 : vector<16x1xf32>
    %18 = vector.broadcast %17 : vector<16x1xf32> to vector<16x128xf32>
    %19 = arith.mulf %18, %9 : vector<16x128xf32>
    %c0_10 = arith.constant 0 : index
    %c0_11 = arith.constant 0 : index
    %20 = vector.load %arg5[%c0_10, %c0_11] : memref<128x128xf32, #tpu.memory_space<vmem>>, vector<128x128xf32>
    %cst_12 = arith.constant dense<0.000000e+00> : vector<16x128xf32>
    %21 = tpu.matmul %19, %20, %cst_12 {dimension_numbers = #tpu.dot_dimension_numbers<[1], [0], [0], [1], [0, 0, 1, 1], [], []>} : vector<16x128xf32>, vector<128x128xf32>, vector<16x128xf32> -> vector<16x128xf32>
    %22 = arith.addf %4, %21 : vector<16x128xf32>
    %c0_13 = arith.constant 0 : index
    %c0_14 = arith.constant 0 : index
    %23 = vector.load %arg6[%c0_13, %c0_14] : memref<1x128xf32, #tpu.memory_space<vmem>>, vector<1x128xf32>
    %24 = vector.broadcast %23 : vector<1x128xf32> to vector<16x128xf32>
    %25 = arith.addf %22, %24 : vector<16x128xf32>
    %c0_15 = arith.constant 0 : index
    %c0_16 = arith.constant 0 : index
    %26 = vector.load %arg7[%c0_15, %c0_16] : memref<16x128xf32, #tpu.memory_space<vmem>>, vector<16x128xf32>
    tpu.vector_store %arg7[%c0_15, %c0_16], %25 {strides = array<i32>} : memref<16x128xf32, #tpu.memory_space<vmem>>, vector<16x128xf32>,
    return
  }
  func.func @transform_0(%arg0: i32) -> (i32, i32) {
    %c0_i32 = arith.constant 0 : i32
    %c0_i32_0 = arith.constant 0 : i32
    return %arg0, %c0_i32 : i32, i32
  }
  func.func @transform_1(%arg0: i32) -> (i32, i32) {
    %c0_i32 = arith.constant 0 : i32
    %c0_i32_0 = arith.constant 0 : i32
    return %arg0, %c0_i32 : i32, i32
  }
  func.func @transform_2(%arg0: i32) -> (i32, i32) {
    %c0_i32 = arith.constant 0 : i32
    %c0_i32_0 = arith.constant 0 : i32
    %c0_i32_1 = arith.constant 0 : i32
    return %c0_i32, %c0_i32_0 : i32, i32
  }
  func.func @transform_3(%arg0: i32) -> (i32, i32) {
    %c0_i32 = arith.constant 0 : i32
    %c0_i32_0 = arith.constant 0 : i32
    %c0_i32_1 = arith.constant 0 : i32
    return %c0_i32, %c0_i32_0 : i32, i32
  }
  func.func @transform_4(%arg0: i32) -> (i32, i32) {
    %c0_i32 = arith.constant 0 : i32
    %c0_i32_0 = arith.constant 0 : i32
    %c0_i32_1 = arith.constant 0 : i32
    return %c0_i32, %c0_i32_0 : i32, i32
  }
  func.func @transform_5(%arg0: i32) -> (i32, i32) {
    %c0_i32 = arith.constant 0 : i32
    %c0_i32_0 = arith.constant 0 : i32
    %c0_i32_1 = arith.constant 0 : i32
    return %c0_i32, %c0_i32_0 : i32, i32
  }
  func.func @transform_6(%arg0: i32) -> (i32, i32) {
    %c0_i32 = arith.constant 0 : i32
    %c0_i32_0 = arith.constant 0 : i32
    return %arg0, %c0_i32 : i32, i32
  }
}

</mosaic_0001>

<bundles_post_ra>
// kernel: tpu_custom_call.1
= control target key start
LH: loop header
LB: loop body
LE: loop exit
PB: predicated region body
PF: predicated region fallthrough
CT: control target
= control target key end

     0   :  { %11 = vsyncpa [#allocation3], 0  ;;  %s724_s0 = inlined_call_operand.hbm [shape: f32[16,32], index: 0, kind: input, shape index: {}]   ;;  %s725_s1 = inlined_call_operand.hbm [shape: f32[16,48], index: 1, kind: input, shape index: {}]   ;;  %s726_s2 = inlined_call_operand.hbm [shape: f32[32,256], index: 2, kind: input, shape index: {}]   ;;  %s727_s3 = inlined_call_operand.hbm [shape: f32[48,256], index: 3, kind: input, shape index: {}]   ;;  %s728_s4 = inlined_call_operand.hbm [shape: f32[128,128], index: 4, kind: input, shape index: {}]   ;;  %s729_s5 = inlined_call_operand.vmem [shape: f32[1,128], index: 5, kind: input, shape index: {}]   ;;  %s730_s6 = inlined_call_operand.hbm [shape: f32[16,128], index: 6, kind: output, shape index: {}]  }
   0x1   :  { %12 = vsyncpa [#allocation6], 0 }
   0x2   :  { %13 = vsyncpa [#allocation9], 0 }
   0x3   :  { %14 = vsyncpa [#allocation4], 0  ;;  %s634_s21 = smov [#allocation5]  }
   0x4   :  { %s32_s22 = sshll.u32 %s634_s21, 4  ;;  %s33_s22 = int_to_ptr.vmem [resolvable:$true] %s32_s22 }
   0x5   :  { %s514_s23 = scalar_lea.vmem %s33_s22, 256  ;;  %p519_p1 = scmp.lt.s32.totalorder %s33_s22, %s33_s22 }
   0x6   :  { %p515_p0 = scmp.ne.s32.totalorder %s33_s22, %s514_s23  ;;  %p520_p2 = scmp.lt.s32.totalorder %s514_s23, %s514_s23 }
   0x8   :  { %p521_p3 = por %p520_p2, %p519_p1 }
   0xa   :  { %p522_p4 = pnand %p521_p3, %p515_p0 }
   0xc   :  { %525 = shalt.err (!%p522_p4)
}
   0xd   :  { %s635_s24 = smov 128   ;;  %s636_s25 = smov 8  }
   0xe   :  { %38 = dma.hbm_to_vmem [thread:$0]  %s725_s1, 256, %s33_s22, [#allocation6], %s635_s24, %s635_s24, %s636_s25  }
   0xf   :  { %s637_s28 = smov [#allocation8]   ;;  %s638_s30 = smov [#allocation2]  }
  0x10   :  { %s56_s29 = sshll.u32 %s637_s28, 4  ;;  %s20_s7 = sshll.u32 %s638_s30, 4  ;;  %s57_s29 = int_to_ptr.vmem [resolvable:$true] %s56_s29  ;;  %s21_s7 = int_to_ptr.vmem [resolvable:$true] %s20_s7 }
  0x11   :  { %s534_s8 = scalar_lea.vmem %s57_s29, 1536  ;;  %p539_p6 = scmp.lt.s32.totalorder %s57_s29, %s57_s29 }
  0x12   :  { %p535_p5 = scmp.ne.s32.totalorder %s57_s29, %s534_s8  ;;  %p540_p7 = scmp.lt.s32.totalorder %s534_s8, %s534_s8 }
  0x14   :  { %p541_p8 = por %p540_p7, %p539_p6 }
  0x16   :  { %p542_p9 = pnand %p541_p8, %p535_p5 }
  0x18   :  { %545 = shalt.err (!%p542_p9)
}
  0x19   :  { %s639_s9 = smov 256   ;;  %s640_s10 = smov 16  }
  0x1a   :  { %62 = dma.hbm_to_vmem [thread:$0]  %s727_s3, 1536, %s57_s29, [#allocation9], %s639_s9, %s639_s9, %s640_s10  }
  0x1b   :  { %s554_s1 = scalar_lea.vmem %s21_s7, 256  ;;  %p559_p11 = scmp.lt.s32.totalorder %s21_s7, %s21_s7 }
  0x1c   :  { %p555_p10 = scmp.ne.s32.totalorder %s21_s7, %s554_s1  ;;  %p560_p12 = scmp.lt.s32.totalorder %s554_s1, %s554_s1 }
  0x1e   :  { %p561_p13 = por %p560_p12, %p559_p11 }
  0x20   :  { %p562_p0 = pnand %p561_p13, %p555_p10 }
  0x22   :  { %565 = shalt.err (!%p562_p0)
}
  0x23   :  { %26 = dma.hbm_to_vmem [thread:$0]  %s724_s0, 256, %s21_s7, [#allocation3], %s635_s24, %s635_s24, %s636_s25  }
  0x24   :  { %s641_s15 = smov [#allocation7]   ;;  %s642_s17 = smov [#allocation10]  }
  0x25   :  { %s44_s16 = sshll.u32 %s641_s15, 4  ;;  %s68_s3 = sshll.u32 %s642_s17, 4  ;;  %s45_s16 = int_to_ptr.vmem [resolvable:$true] %s44_s16  ;;  %s69_s3 = int_to_ptr.vmem [resolvable:$true] %s68_s3 }
  0x26   :  { %s574_s18 = scalar_lea.vmem %s45_s16, 1024  ;;  %p579_p2 = scmp.lt.s32.totalorder %s45_s16, %s45_s16 }
  0x27   :  { %p575_p1 = scmp.ne.s32.totalorder %s45_s16, %s574_s18  ;;  %p580_p3 = scmp.lt.s32.totalorder %s574_s18, %s574_s18 }
  0x29   :  { %p581_p4 = por %p580_p3, %p579_p2 }
  0x2b   :  { %p582_p5 = pnand %p581_p4, %p575_p1 }
  0x2d   :  { %585 = shalt.err (!%p582_p5)
}
  0x2e   :  { %50 = dma.hbm_to_vmem [thread:$0]  %s726_s2, 1024, %s45_s16, [#allocation6], %s639_s9, %s639_s9, %s640_s10  }
  0x2f   :  { %s594_s21 = scalar_lea.vmem %s69_s3, 2048  ;;  %p599_p7 = scmp.lt.s32.totalorder %s69_s3, %s69_s3 }
  0x30   :  { %p595_p6 = scmp.ne.s32.totalorder %s69_s3, %s594_s21  ;;  %p600_p8 = scmp.lt.s32.totalorder %s594_s21, %s594_s21 }
  0x32   :  { %p601_p9 = por %p600_p8, %p599_p7 }
  0x34   :  { %p602_p10 = pnand %p601_p9, %p595_p6 }
  0x36   :  { %605 = shalt.err (!%p602_p10)
}
  0x37   :  { %74 = dma.hbm_to_vmem [thread:$0]  %s728_s4, 2048, %s69_s3, [#allocation9], %s635_s24, %s635_s24, %s636_s25  }
  0x38   :  { %626 = dma.done.wait [#allocation3], 256  }
  0x39   :  { %627 = vsyncadd [#allocation3], 4294967040 }
  0x3a   :  { %628 = dma.done.wait [#allocation6], 1280  }
  0x3b   :  { %629 = vsyncadd [#allocation6], 4294966016 }
  0x3c   :  { %630 = dma.done.wait [#allocation9], 3584  }
  0x3d   :  { %631 = vsyncadd [#allocation9], 4294963712  ;;  %v643_v0 = vmov 0.0   ;;  %v103_v1 = vld [vmem:[#allocation7 + $0x38] sm:$0xff]  ;;  %v102_v2 = vld [vmem:[#allocation7 + $0x30] sm:$0xff]  ;;  %vm104_vm0 = vcmask 261120  }
  0x3e   :  { %175 = vmatprep.mubr.f32.mxu1 %v643_v0  ;;  %v101_v3 = vld [vmem:[#allocation7 + $0x28] sm:$0xff]  ;;  %135 = vmatprep.subr.mxu1 %v103_v1  ;;  %v100_v4 = vld [vmem:[#allocation7 + $0x20] sm:$0xff]  ;;  %v99_v5 = vld [vmem:[#allocation7 + $0x18] sm:$0xff]  ;;  %vm200_vm1 = vcmask 392192   ;;  %s644_s23 = smov [#allocation11]  }
  0x3f   :  { %136 = vmatpush1.msra.mxu1 %v102_v2  ;;  %v98_v6 = vld [vmem:[#allocation7 + $0x10] sm:$0xff]  ;;  %v97_v7 = vld [vmem:[#allocation7 + $0x8] sm:$0xff]  ;;  %v96_v8 = vld [vmem:[#allocation7] sm:$0xff]  ;;  %s413_s26 = sshll.u32 %s644_s23, 4  ;;  %s414_s26 = int_to_ptr.vmem [resolvable:$true] %s413_s26 }
  0x40   :  { %137 = vmatprep.subr.mxu1 %v101_v3  ;;  %v92_v9 = vld [vmem:[#allocation2] sm:$0xff]  ;;  %v199_v10 = vld [vmem:[#allocation8 + $0x58] sm:$0xff]  ;;  %v198_v11 = vld [vmem:[#allocation8 + $0x50] sm:$0xff]  ;;  %s606_s27 = scalar_lea.vmem %s414_s26, 256  ;;  %p611_p12 = scmp.lt.s32.totalorder %s414_s26, %s414_s26 }
  0x41   :  { %138 = vmatpush1.msra.mxu1 %v100_v4  ;;  %v197_v12 = vld [vmem:[#allocation8 + $0x48] sm:$0xff]  ;;  %v196_v13 = vld [vmem:[#allocation8 + $0x40] sm:$0xff]  ;;  %v195_v14 = vld [vmem:[#allocation8 + $0x38] sm:$0xff]  ;;  %p607_p11 = scmp.ne.s32.totalorder %s414_s26, %s606_s27  ;;  %p612_p13 = scmp.lt.s32.totalorder %s606_s27, %s606_s27 }
  0x42   :  { %139 = vmatprep.subr.mxu1 %v99_v5  ;;  %v93_v15 = vld [vmem:[#allocation2 + $0x8] sm:$0xff]  ;;  %v194_v16 = vld [vmem:[#allocation8 + $0x30] sm:$0xff]  ;;  %v192_v18 = vld [vmem:[#allocation8 + $0x20] sm:$0xff] }
  0x43   :  { %140 = vmatpush1.msra.mxu1 %v98_v6  ;;  %v193_v17 = vld [vmem:[#allocation8 + $0x28] sm:$0xff]  ;;  %v191_v19 = vld [vmem:[#allocation8 + $0x18] sm:$0xff]  ;;  %v190_v20 = vld [vmem:[#allocation8 + $0x10] sm:$0xff]  ;;  %p613_p0 = por %p612_p13, %p611_p12 }
  0x44   :  { %141 = vmatprep.subr.mxu1 %v97_v7  ;;  %v189_v21 = vld [vmem:[#allocation8 + $0x8] sm:$0xff]  ;;  %v188_v22 = vld [vmem:[#allocation8] sm:$0xff]  ;;  %v94_v23 = vld [vmem:[#allocation5] sm:$0xff] }
  0x45   :  { %142 = vmatpush1.msra.mxu1 %v96_v8  ;;  %v95_v24 = vld [vmem:[#allocation5 + $0x8] sm:$0xff]  ;;  %v318_v35 = vld [vmem:[#allocation10 + $0x70] sm:$0xff]  ;;  %v317_v36 = vld [vmem:[#allocation10 + $0x68] sm:$0xff]  ;;  %p614_p1 = pnand %p613_p0, %p607_p11 }
  0x46   :  { %427 = vmatmul.mubr.msk.f32.vlgmr.msra.gmra.mxu1 %vm104_vm0, %v92_v9  ;;  %227 = vmatprep.subr.mxu1 %v199_v10  ;;  %v319_v34 = vld [vmem:[#allocation10 + $0x78] sm:$0xff]  ;;  %v316_v37 = vld [vmem:[#allocation10 + $0x60] sm:$0xff]  ;;  %v314_v39 = vld [vmem:[#allocation10 + $0x50] sm:$0xff] }
  0x47   :  { %228 = vmatpush1.msra.mxu1 %v198_v11  ;;  %181 = vmatprep.mubr.f32.mxu1 %v643_v0  ;;  %v315_v38 = vld [vmem:[#allocation10 + $0x58] sm:$0xff]  ;;  %v313_v40 = vld [vmem:[#allocation10 + $0x48] sm:$0xff]  ;;  %v312_v41 = vld [vmem:[#allocation10 + $0x40] sm:$0xff] }
  0x48   :  { %229 = vmatprep.subr.mxu1 %v197_v12  ;;  %452 = vmatprep.subr.mxu0 %v319_v34  ;;  %v311_v42 = vld [vmem:[#allocation10 + $0x38] sm:$0xff]  ;;  %v310_v43 = vld [vmem:[#allocation10 + $0x30] sm:$0xff]  ;;  %v309_v44 = vld [vmem:[#allocation10 + $0x28] sm:$0xff] }
  0x49   :  { %230 = vmatpush1.msra.mxu1 %v196_v13  ;;  %453 = vmatpush3.msra.mxu0 %v319_v34  ;;  %v308_v45 = vld [vmem:[#allocation10 + $0x20] sm:$0xff]  ;;  %v307_v46 = vld [vmem:[#allocation10 + $0x18] sm:$0xff]  ;;  %v306_v47 = vld [vmem:[#allocation10 + $0x10] sm:$0xff] }
  0x4a   :  { %231 = vmatprep.subr.mxu1 %v195_v14  ;;  %428 = vmatmul.mubr.msk.f32.gmra.mxu1 %vm104_vm0, %v93_v15  ;;  %v305_v48 = vld [vmem:[#allocation10 + $0x8] sm:$0xff]  ;;  %v304_v49 = vld [vmem:[#allocation10] sm:$0xff] }
  0x4b   :  { %232 = vmatpush1.msra.mxu1 %v194_v16  ;;  %271 = vmatprep.mubr.f32.mxu1 %v643_v0 }
  0x4c   :  { %233 = vmatprep.subr.mxu1 %v193_v17  ;;  %454 = vmatprep.subr.mxu0 %v318_v35 }
  0x4d   :  { %234 = vmatpush1.msra.mxu1 %v192_v18  ;;  %455 = vmatpush3.msra.mxu0 %v318_v35 }
  0x4e   :  { %235 = vmatprep.subr.mxu1 %v191_v19  ;;  %456 = vmatprep.subr.mxu0 %v317_v36 }
  0x4f   :  { %236 = vmatpush1.msra.mxu1 %v190_v20  ;;  %457 = vmatpush3.msra.mxu0 %v317_v36 }
  0x50   :  { %237 = vmatprep.subr.mxu1 %v189_v21  ;;  %458 = vmatprep.subr.mxu0 %v316_v37 }
  0x51   :  { %238 = vmatpush1.msra.mxu1 %v188_v22  ;;  %459 = vmatpush3.msra.mxu0 %v316_v37 }
  0x52   :  { %429 = vmatmul.mubr.msk.f32.vlgmr.msra.gmra.mxu1 %vm200_vm1, %v94_v23  ;;  %460 = vmatprep.subr.mxu0 %v315_v38 }
  0x53   :  { %277 = vmatprep.mubr.f32.mxu1 %v643_v0  ;;  %461 = vmatpush3.msra.mxu0 %v315_v38  ;;  %v433_v0 = vld [vmem:[%s729_s5] ss:$0 sm:$0xff] }
  0x54   :  { %462 = vmatprep.subr.mxu0 %v314_v39 }
  0x55   :  { %463 = vmatpush3.msra.mxu0 %v314_v39 }
  0x56   :  { %430 = vmatmul.mubr.msk.f32.gmra.mxu1 %vm200_vm1, %v95_v24  ;;  %464 = vmatprep.subr.mxu0 %v313_v40 }
  0x57   :  { %465 = vmatpush3.msra.mxu0 %v313_v40 }
  0x58   :  { %466 = vmatprep.subr.mxu0 %v312_v41 }
  0x59   :  { %467 = vmatpush3.msra.mxu0 %v312_v41 }
  0x5a   :  { %468 = vmatprep.subr.mxu0 %v311_v42 }
  0x5b   :  { %469 = vmatpush3.msra.mxu0 %v311_v42 }
  0x5c   :  { %470 = vmatprep.subr.mxu0 %v310_v43 }
  0x5d   :  { %471 = vmatpush3.msra.mxu0 %v310_v43 }
  0x5e   :  { %472 = vmatprep.subr.mxu0 %v309_v44 }
  0x5f   :  { %473 = vmatpush3.msra.mxu0 %v309_v44 }
  0x60   :  { %474 = vmatprep.subr.mxu0 %v308_v45 }
  0x61   :  { %475 = vmatpush3.msra.mxu0 %v308_v45 }
  0x62   :  { %476 = vmatprep.subr.mxu0 %v307_v46 }
  0x63   :  { %477 = vmatpush3.msra.mxu0 %v307_v46 }
  0x64   :  { %478 = vmatprep.subr.mxu0 %v306_v47 }
  0x65   :  { %479 = vmatpush3.msra.mxu0 %v306_v47 }
  0x66   :  { %480 = vmatprep.subr.mxu0 %v305_v48 }
  0x67   :  { %481 = vmatpush3.msra.mxu0 %v305_v48 }
  0x68   :  { %482 = vmatprep.subr.mxu0 %v304_v49 }
  0x69   :  { %483 = vmatpush3.msra.mxu0 %v304_v49 }
 0x106   :  { %v706_v25 = vpop.f32.mrf.mxu1 }
 0x108   :  { %v179_v26 = vpop.f32.mrf.mxu1 }
 0x10a   :  { %v708_v27 = vpop.f32.mrf.mxu1 }
 0x10c   :  { %v185_v28 = vpop.f32.mrf.mxu1 }
 0x112   :  { %v273_v29 = vpop.f32.mrf.mxu1 }
 0x113   :  { %v284_v30 = vmul.f32 %v273_v29, %v179_v26 }
 0x114   :  { %v710_v31 = vpop.f32.mrf.mxu1 }
 0x115   :  { %286 = vadd.xlane.f32.xlu0 %v284_v30 }
 0x116   :  { %v279_v32 = vpop.f32.mrf.mxu1 }
 0x117   :  { %v285_v33 = vmul.f32 %v279_v32, %v185_v28 }
 0x118   :  { %v281_v61 = vpop.f32.mrf.mxu1 }
 0x119   :  { %288 = vadd.xlane.f32.xlu0 %v285_v33 }
 0x19e   :  { %v287_v50 = vpop.xlane.xlu0 %286 }
 0x19f   :  { %v431_v51 = vmul.f32 -1.442695, %v287_v50 }
 0x1a1   :  { %498 = vpow2.f32 %v431_v51 }
 0x1a2   :  { %v289_v52 = vpop.xlane.xlu0 %288 }
 0x1a3   :  { %v432_v53 = vmul.f32 -1.442695, %v289_v52 }
 0x1a5   :  { %500 = vpow2.f32 %v432_v53 }
 0x1ae   :  { %v499_v54 = vpop.eup %498 }
 0x1af   :  { %v296_v55 = vadd.f32 1.0, %v499_v54 }
 0x1b1   :  { %502 = vrcp.f32 %v296_v55 }
 0x1b2   :  { %v501_v56 = vpop.eup %500 }
 0x1b3   :  { %v297_v57 = vadd.f32 1.0, %v501_v56 }
 0x1b5   :  { %504 = vrcp.f32 %v297_v57 }
 0x1be   :  { %v503_v58 = vpop.eup %502 }
 0x1bf   :  { %v302_v59 = vmul.f32 %v503_v58, %v710_v31 }
 0x1c1   :  { %484 = vmatprep.mubr.f32.mxu0 %v302_v59 }
 0x1c2   :  { %v505_v60 = vpop.eup %504 }
 0x1c3   :  { %v303_v62 = vmul.f32 %v505_v60, %v281_v61 }
 0x1c5   :  { %485 = vmatmul.mubr.f32.vlgmr.msra.gmra.mxu0 %v303_v62 }
 0x285   :  { %v486_v63 = vpop.f32.mrf.mxu0 }
 0x286   :  { %v396_v1 = vadd.f32 %v486_v63, %v708_v27 }
 0x287   :  { %v386_v2 = vpop.f32.mrf.mxu0 }
 0x288   :  { %v405_v3 = vadd.f32 %v433_v0, %v396_v1  ;;  %v395_v4 = vadd.f32 %v386_v2, %v706_v25 }
 0x28a   :  { %407 = vst [vmem:[#allocation11 + $0x8] sm:$0xff] %v405_v3  ;;  %v404_v5 = vadd.f32 %v433_v0, %v395_v4 }
 0x28c   :  { %406 = vst [vmem:[#allocation11] sm:$0xff] %v404_v5 }
 0x28d   :  { %617 = shalt.err (!%p614_p1)
}
 0x28e   :  { %419 = dma.vmem_to_hbm [thread:$0]  %s414_s26, 256, %s730_s6, [#allocation4], %s635_s24, %s635_s24, %s636_s25  }
 0x28f   :  { %632 = dma.done.wait [#allocation4], 256  }
 0x290   :  { %633 = vsyncadd [#allocation4], 4294967040 }
 0x291   :  { %423 = vsyncpa [#allocation3], 1 }
 0x292   :  { %424 = vsyncpa [#allocation6], 1 }
 0x293   :  { %425 = vsyncpa [#allocation9], 1 }
 0x294   :  { %426 = vsyncpa [#allocation4], 1 }

</bundles_post_ra>
